<compile_context>
chip_gen: v7x
topology: tpu7x:2x2x1
jax: 0.10.0
libtpu: 0.0.40
codegen_flags: <defaults>
</compile_context>

<pallas_src>
import math

import jax
import jax.numpy as jnp
from jax.experimental import pallas as pl
from jax.experimental.pallas import tpu as pltpu

_LANE = 128
_SUBLANE = 8


def _round_up(x, m):
    return ((x + m - 1) // m) * m


def _linear_kernel(x_ref, w_ref, b_ref, o_ref):
    # x_ref: (tm, r*K), w_ref: (r*K, r*N), b_ref: (1, r*N), o_ref: (tm, r*N)
    acc = jnp.dot(x_ref[...], w_ref[...], preferred_element_type=jnp.float32)
    o_ref[...] = (acc + b_ref[...].astype(jnp.float32)).astype(o_ref.dtype)


def pack_spatial_pe_params(weight, bias):
    """Pre-pack params for the lane-dense kernel.

    weight: (N, K) PyTorch-layout Linear weight; bias: (N,).
    Returns (r, w_packed, b_packed) where r is the row-packing factor,
    w_packed is the (r*K, r*N) block-diagonal replication of W.T and
    b_packed is the (1, r*N) tiled bias.
    """
    N, K = weight.shape
    w_t = weight.T  # (K, N)
    if 0 < N < _LANE and _LANE % N == 0:
        r = _LANE // N
    else:
        r = 1
    if r == 1:
        return 1, w_t, bias.reshape(1, N)
    wp = jnp.zeros((r * K, r * N), dtype=weight.dtype)
    for j in range(r):
        wp = wp.at[j * K:(j + 1) * K, j * N:(j + 1) * N].set(w_t)
    bp = jnp.tile(bias.reshape(1, N), (1, r))
    return r, wp, bp


def spatial_pe_pallas(spa_mx, weight, bias, *, tile_rows=16384,
                      min_pallas_rows=1024, force_pallas=False, packed=None):
    """out = (spa_mx @ weight.T + bias)[None, None]  (PyTorch Linear convention).

    spa_mx: (M, SE_dim), weight: (embed_dim, SE_dim), bias: (embed_dim,).
    """
    M, K = spa_mx.shape
    N, K_w = weight.shape
    assert K == K_w, "weight in_features mismatch"

    # Small-M fast path: for tiny graphs the fixed pallas_call / pipeline setup
    # overhead dwarfs the matmul; XLA's fused dot is strictly faster.
    if M < min_pallas_rows and not force_pallas:
        out2d = spa_mx @ weight.T + bias
        return out2d[None, None, :, :]

    if packed is None:
        packed = pack_spatial_pe_params(weight, bias)
    r, wp, bp = packed

    # Lane-dense view: r consecutive node rows form one packed row, so the
    # packed output last dim is r*N (= 128 when N divides 128).  Both reshapes
    # are free row-major views in HBM; pad M to a multiple of r first.
    M_pad = _round_up(M, r)
    x = spa_mx
    if M_pad != M:
        x = jnp.pad(x, ((0, M_pad - M), (0, 0)))
    Mp = M_pad // r
    xp = x.reshape(Mp, r * K)

    # Tile selection (packed rows).  Large tiles amortize per-step overhead;
    # always emit >= 2 grid steps for non-tiny inputs so v7x's second
    # TensorCore participates via the "parallel" axis.  Working set at the
    # default target (16K node rows -> 4K packed rows): ~0.5 MiB in + 2 MiB out
    # per buffer, ~5 MiB double-buffered -> well under every generation's
    # scoped-VMEM default, so no vmem_limit override is needed.
    target = max(_SUBLANE, ((tile_rows // r) // _SUBLANE) * _SUBLANE)
    if Mp <= 2 * _SUBLANE:
        tm = Mp                                   # block == full dim
    else:
        tm = min(target, _round_up(pl.cdiv(Mp, 2), _SUBLANE))
    grid = (pl.cdiv(Mp, tm),)

    rK = r * K
    rN = r * N
    out_p = pl.pallas_call(
        _linear_kernel,
        out_shape=jax.ShapeDtypeStruct((Mp, rN), spa_mx.dtype),
        grid=grid,
        in_specs=[
            pl.BlockSpec((tm, rK), lambda i: (i, 0)),   # packed node tile
            pl.BlockSpec((rK, rN), lambda i: (0, 0)),   # packed weight, resident
            pl.BlockSpec((1, rN), lambda i: (0, 0)),    # packed bias, resident
        ],
        out_specs=pl.BlockSpec((tm, rN), lambda i: (i, 0)),
        compiler_params=pltpu.CompilerParams(
            dimension_semantics=("parallel",),   # node tiles are independent
        ),
    )(xp, wp, bp)

    out2d = out_p.reshape(M_pad, N)[:M]
    # .unsqueeze(0).unsqueeze(0)
    return out2d[None, None, :, :]


class SpatialPE:
    """Mirror of the PyTorch SpatialPE module (forward only)."""

    def __init__(self, SE_dim, embed_dim, *, key=None, dtype=jnp.float32,
                 tile_rows=16384, min_pallas_rows=1024):
        if key is None:
            key = jax.random.PRNGKey(0)
        kw, kb = jax.random.split(key)
        # PyTorch nn.Linear default init: U(-1/sqrt(in), 1/sqrt(in))
        bound = 1.0 / math.sqrt(SE_dim)
        self.weight = jax.random.uniform(
            kw, (embed_dim, SE_dim), dtype=dtype, minval=-bound, maxval=bound)
        self.bias = jax.random.uniform(
            kb, (embed_dim,), dtype=dtype, minval=-bound, maxval=bound)
        self.tile_rows = tile_rows
        self.min_pallas_rows = min_pallas_rows
        # Hoisted out of the per-call path: transpose + lane-dense packing.
        self._packed = pack_spatial_pe_params(self.weight, self.bias)

    def __call__(self, spa_mx, *, force_pallas=False):
        return spatial_pe_pallas(
            spa_mx, self.weight, self.bias,
            tile_rows=self.tile_rows,
            min_pallas_rows=self.min_pallas_rows,
            force_pallas=force_pallas,
            packed=self._packed)


if __name__ == "__main__":
    key = jax.random.PRNGKey(0)
    k_params, k_x1, k_x2 = jax.random.split(key, 3)

    SE_dim, embed_dim = 8, 32
    module = SpatialPE(SE_dim, embed_dim, key=k_params)

    def ref_fn(x):
        return (x @ module.weight.T + module.bias)[None, None, :, :]

    # (1) tiny graph -> exercises the small-M XLA fast path
    x_small = jax.random.normal(k_x1, (16, SE_dim), dtype=jnp.float32)
    out_small = jax.block_until_ready(module(x_small))
    assert out_small.shape == (1, 1, 16, embed_dim), out_small.shape
    assert jnp.allclose(out_small, ref_fn(x_small), atol=1e-5, rtol=1e-5), \
        "fast-path mismatch vs reference"

    # (2) moderate graph with a ragged row count -> exercises the Pallas path
    #     (lane-packed 128-wide output blocks, multi-step parallel grid,
    #      padded tail rows that are computed but sliced off)
    n_nodes = 2050
    x_big = jax.random.normal(k_x2, (n_nodes, SE_dim), dtype=jnp.float32)
    out_big = jax.block_until_ready(module(x_big))
    assert out_big.shape == (1, 1, n_nodes, embed_dim), out_big.shape
    assert jnp.allclose(out_big, ref_fn(x_big), atol=1e-4, rtol=1e-4), \
        "pallas-path mismatch vs reference"

    print("KERNEL_OK")
</pallas_src>

<mosaic_0001>
module attributes {stable_mosaic.version = 11 : i64} {
  func.func @_linear_kernel(%arg0: i32, %arg1: memref<264x32xf32, #tpu.memory_space<vmem>>, %arg2: memref<32x128xf32, #tpu.memory_space<vmem>>, %arg3: memref<1x128xf32, #tpu.memory_space<vmem>>, %arg4: memref<264x128xf32, #tpu.memory_space<vmem>>) attributes {dimension_semantics = [#tpu.dimension_semantics<parallel>], iteration_bounds = array<i64: 2>, scalar_prefetch = 0 : i64, scratch_operands = 0 : i64, tpu.core_type = #tpu.core_type<tc>, window_params = [{transform_indices = @transform_0, window_bounds = array<i64: 264, 32>}, {pipeline_mode = #tpu.pipeline_mode<synchronous>, transform_indices = @transform_1, window_bounds = array<i64: 32, 128>}, {pipeline_mode = #tpu.pipeline_mode<synchronous>, transform_indices = @transform_2, window_bounds = array<i64: 1, 128>}, {transform_indices = @transform_3, window_bounds = array<i64: 264, 128>}]} {
    %c0 = arith.constant 0 : index
    %c0_0 = arith.constant 0 : index
    %0 = vector.load %arg1[%c0, %c0_0] : memref<264x32xf32, #tpu.memory_space<vmem>>, vector<264x32xf32>
    %c0_1 = arith.constant 0 : index
    %c0_2 = arith.constant 0 : index
    %1 = vector.load %arg2[%c0_1, %c0_2] : memref<32x128xf32, #tpu.memory_space<vmem>>, vector<32x128xf32>
    %cst = arith.constant dense<0.000000e+00> : vector<264x128xf32>
    %2 = tpu.matmul %0, %1, %cst {dimension_numbers = #tpu.dot_dimension_numbers<[1], [0], [0], [1], [0, 0, 1, 1], [], []>} : vector<264x32xf32>, vector<32x128xf32>, vector<264x128xf32> -> vector<264x128xf32>
    %c0_3 = arith.constant 0 : index
    %c0_4 = arith.constant 0 : index
    %3 = vector.load %arg3[%c0_3, %c0_4] : memref<1x128xf32, #tpu.memory_space<vmem>>, vector<1x128xf32>
    %4 = vector.broadcast %3 : vector<1x128xf32> to vector<264x128xf32>
    %5 = arith.addf %2, %4 : vector<264x128xf32>
    %c0_5 = arith.constant 0 : index
    %c0_6 = arith.constant 0 : index
    %6 = vector.load %arg4[%c0_5, %c0_6] : memref<264x128xf32, #tpu.memory_space<vmem>>, vector<264x128xf32>
    tpu.vector_store %arg4[%c0_5, %c0_6], %5 {strides = array<i32>} : memref<264x128xf32, #tpu.memory_space<vmem>>, vector<264x128xf32>,
    return
  }
  func.func @transform_0(%arg0: i32) -> (i32, i32) {
    %c0_i32 = arith.constant 0 : i32
    %c0_i32_0 = arith.constant 0 : i32
    return %arg0, %c0_i32 : i32, i32
  }
  func.func @transform_1(%arg0: i32) -> (i32, i32) {
    %c0_i32 = arith.constant 0 : i32
    %c0_i32_0 = arith.constant 0 : i32
    %c0_i32_1 = arith.constant 0 : i32
    return %c0_i32, %c0_i32_0 : i32, i32
  }
  func.func @transform_2(%arg0: i32) -> (i32, i32) {
    %c0_i32 = arith.constant 0 : i32
    %c0_i32_0 = arith.constant 0 : i32
    %c0_i32_1 = arith.constant 0 : i32
    return %c0_i32, %c0_i32_0 : i32, i32
  }
  func.func @transform_3(%arg0: i32) -> (i32, i32) {
    %c0_i32 = arith.constant 0 : i32
    %c0_i32_0 = arith.constant 0 : i32
    return %arg0, %c0_i32 : i32, i32
  }
}

</mosaic_0001>

<bundles_post_ra>
// kernel: tpu_custom_call.1
= control target key start
LH: loop header
LB: loop body
LE: loop exit
PB: predicated region body
PF: predicated region fallthrough
CT: control target
= control target key end

     0   :  { %8 = vsyncpa [#allocation3], 0  ;;  %s1361_s0 = inlined_call_operand.vmem [shape: f32[513,32], index: 0, kind: input, shape index: {}]   ;;  %s1362_s1 = inlined_call_operand.vmem [shape: f32[32,128], index: 1, kind: input, shape index: {}]   ;;  %s1363_s2 = inlined_call_operand.vmem [shape: f32[1,128], index: 2, kind: input, shape index: {}]   ;;  %s1364_s3 = inlined_call_operand.hbm [shape: f32[513,128], index: 3, kind: output, shape index: {}]  }
   0x1   :  { %10 = vsyncpa [#allocation3 + $0x1], 0  ;;  %s1020_s12 = smov 0   ;;  %s1022_s13 = smov 0  }
   0x2   :  { %s1024_s14 = smov 0   ;;  %s1026_s15 = smov 0  }
   0x3 LB: > { %s1041_s16 = sadd.s32 4294967295, %s992_s15   ;;  %s685_s17 = sadd.s32 4294967294, %s992_s15   ;;  %s992_s15 = sphi %s1026_s15, %s1370_s15   ;;  %s988_s14 = sphi %s1024_s14, %s1369_s14   ;;  %s984_s13 = sphi %s1022_s13, %s1368_s13   ;;  %s980_s12 = sphi %s1020_s12, %s1367_s12  }
   0x4   : > { %s1045_s18 = sadd.s32 1, %s992_s15   ;;  %s91_s19 = sadd.s32 1, %s988_s14 }
   0x5   : > { %s88_s20 = ssub.s32 %s992_s15, %s1045_s18  ;;  %p101_p0 = scmp.ne.s32.totalorder %s988_s14, %s984_s13 }
   0x6   : > { %p89_p1 = scmp.eq.s32.totalorder %s88_s20, 0  ;;  %p102_p2 = scmp.eq.s32.totalorder %s1041_s16, 1 }
   0x7   : > { %p107_p3 = scmp.ne.s32.totalorder %s984_s13, %s980_s12  ;;  %p108_p4 = scmp.eq.s32.totalorder %s685_s17, 1 }
   0x8   : > { %s1056_s21 = scalar_select %p89_p1, %s988_s14, %s91_s19  }
   0x9   : > { %p1058_p5 = por %p102_p2, %p101_p0  ;;  %p1062_p6 = por %p108_p4, %p107_p3 }
   0xa   : > { %p688_p7 = scmp.ge.s32.totalorder %s992_s15, 1  ;;  %p149_p8 = scmp.lt.s32.totalorder %s992_s15, 3 }
   0xc   : > { %p150_p9 = pnand %p688_p7, %p149_p8 }
   0xd   : > { %v229_v0 = vld [vmem:[%s1362_s1] sm:$0xff] (!%p150_p9)  ;;  %v230_v1 = vld [vmem:[%s1362_s1 + $0x8] sm:$0xff] (!%p150_p9)  ;;  %v231_v2 = vld [vmem:[%s1362_s1 + $0x10] sm:$0xff] (!%p150_p9)  ;;  %v994_v3 = vmov (!%p150_p9), 0.0|0.0   ;;  %s1081_s5 = smul.u32 (!%p150_p9), 33, %s1041_s16  ;;  %vm995_vm0 = vmmov (!%p150_p9), 0  }
   0xe   : > { %153 = sbr.rel (%p150_p9) target bundleno = 333 (0x14d), region = 32  ;;  %876 = vmatprep.subr.bf16.mxu0 (!%p150_p9), %v994_v3  ;;  %v877_v4 = vpack.c.bf16 (!%p150_p9), %v230_v1, %v229_v0  ;;  %882 = vmatprep.subr.bf16.mxu1 (!%p150_p9), %v994_v3  ;;  %v232_v5 = vld [vmem:[%s1362_s1 + $0x18] sm:$0xff] (!%p150_p9)  ;;  %v996_v6 = vmov (!%p150_p9), 0.0   ;;  %vm240_vm1 = vcmask (!%p150_p9), 261120   ;;  %s174_s11 = sand.u32 (!%p150_p9), 1, %s984_s13  }
   0xf   : > { %777 = vmatprep.mubr.msk.f32.mxu0 (!%p150_p9), %vm995_vm0, %v996_v6  ;;  %828 = vmatprep.mubr.msk.f32.mxu1 (!%p150_p9), %vm995_vm0, %v996_v6  ;;  %v880_v7 = vpack.c.bf16 (!%p150_p9), %v232_v5, %v231_v2  ;;  %p182_p10 = scmp.lt.s32.totalorder (!%p150_p9), %s1081_s5, 64  ;;  %s886_s17 = smul.u32 (!%p150_p9), 264, %s174_s11  ;;  %v1228_v41 = vld [vmem:[%s1363_s2] ss:$0 sm:$0xff] (!%p150_p9) }
  0x10   : > { %878 = vmatpush3.bf16.msra.mxu0 (!%p150_p9), %v877_v4  ;;  %884 = vmatpush3.bf16.msra.mxu1 (!%p150_p9), %v877_v4  ;;  %s1300_s25 = scalar_lea.sflag (!%p150_p9), [#allocation3], %s174_s11 }
  0x11   : > { %879 = vmatprep.subr.bf16.mxu0 (!%p150_p9), %v994_v3  ;;  %883 = vmatprep.subr.bf16.mxu1 (!%p150_p9), %v994_v3  ;;  %s1232_s24 = scalar_lea.vmem (!%p150_p9), [#allocation2], %s886_s17 }
  0x14   : > { %881 = vmatpush3.bf16.msra.mxu0 (!%p150_p9), %v880_v7  ;;  %885 = vmatpush3.bf16.msra.mxu1 (!%p150_p9), %v880_v7 }
  0x15   : > { %s183_s6 = scalar_select %p182_p10, %s1081_s5, 64 }
  0x16   : > { %s612_s26 = ssub.s32 (%p1058_p5), 65, %s1081_s5 }
  0x17   : > { %s689_s7 = sshll.u32 %s183_s6, 3  ;;  %p613_p11 = scmp.lt.s32.totalorder (%p1058_p5), %s612_s26, 33 }
  0x18   : > { %s1092_s10 = scalar_lea.vmem %s1361_s0, %s689_s7 }
  0x19   : > { %v196_v8 = vld [vmem:[%s1092_s10] sm:$0xff]  ;;  %v213_v9 = vld [vmem:[%s1092_s10 + $0x88] sm:$0xff]  ;;  %v214_v11 = vld [vmem:[%s1092_s10 + $0x90] sm:$0xff] }
  0x1a   : > { %778 = vmatmul.mubr.msk.f32.vlgmr.msra.gmra.mrb[0].mxu0 %vm240_vm1, %v196_v8  ;;  %829 = vmatmul.mubr.msk.f32.vlgmr.msra.gmra.mrb[0].mxu1 %vm240_vm1, %v213_v9  ;;  %v197_v10 = vld [vmem:[%s1092_s10 + $0x8] sm:$0xff]  ;;  %v198_v12 = vld [vmem:[%s1092_s10 + $0x10] sm:$0xff]  ;;  %v215_v13 = vld [vmem:[%s1092_s10 + $0x98] sm:$0xff] }
  0x1b   : > { %780 = vmatprep.mubr.msk.f32.mxu0 %vm995_vm0, %v996_v6  ;;  %831 = vmatprep.mubr.msk.f32.mxu1 %vm995_vm0, %v996_v6  ;;  %v199_v14 = vld [vmem:[%s1092_s10 + $0x18] sm:$0xff]  ;;  %v216_v15 = vld [vmem:[%s1092_s10 + $0xa0] sm:$0xff]  ;;  %v217_v17 = vld [vmem:[%s1092_s10 + $0xa8] sm:$0xff] }
  0x1c   : > { %v200_v16 = vld [vmem:[%s1092_s10 + $0x20] sm:$0xff]  ;;  %v201_v18 = vld [vmem:[%s1092_s10 + $0x28] sm:$0xff]  ;;  %v218_v19 = vld [vmem:[%s1092_s10 + $0xb0] sm:$0xff] }
  0x1d   : > { %v202_v20 = vld [vmem:[%s1092_s10 + $0x30] sm:$0xff]  ;;  %v219_v21 = vld [vmem:[%s1092_s10 + $0xb8] sm:$0xff]  ;;  %v220_v23 = vld [vmem:[%s1092_s10 + $0xc0] sm:$0xff] }
  0x1e   : > { %781 = vmatmul.mubr.msk.f32.gmra.mrb[2].mxu0 %vm240_vm1, %v197_v10  ;;  %832 = vmatmul.mubr.msk.f32.gmra.mrb[2].mxu1 %vm240_vm1, %v214_v11  ;;  %v203_v22 = vld [vmem:[%s1092_s10 + $0x38] sm:$0xff]  ;;  %v204_v24 = vld [vmem:[%s1092_s10 + $0x40] sm:$0xff]  ;;  %v221_v25 = vld [vmem:[%s1092_s10 + $0xc8] sm:$0xff] }
  0x1f   : > { %783 = vmatprep.mubr.msk.f32.mxu0 %vm995_vm0, %v996_v6  ;;  %834 = vmatprep.mubr.msk.f32.mxu1 %vm995_vm0, %v996_v6  ;;  %v205_v26 = vld [vmem:[%s1092_s10 + $0x48] sm:$0xff]  ;;  %v222_v27 = vld [vmem:[%s1092_s10 + $0xd0] sm:$0xff]  ;;  %v223_v29 = vld [vmem:[%s1092_s10 + $0xd8] sm:$0xff] }
  0x20   : > { %v206_v28 = vld [vmem:[%s1092_s10 + $0x50] sm:$0xff]  ;;  %v207_v30 = vld [vmem:[%s1092_s10 + $0x58] sm:$0xff]  ;;  %v224_v31 = vld [vmem:[%s1092_s10 + $0xe0] sm:$0xff] }
  0x21   : > { %v208_v32 = vld [vmem:[%s1092_s10 + $0x60] sm:$0xff]  ;;  %v225_v33 = vld [vmem:[%s1092_s10 + $0xe8] sm:$0xff]  ;;  %v226_v35 = vld [vmem:[%s1092_s10 + $0xf0] sm:$0xff] }
  0x22   : > { %784 = vmatmul.mubr.msk.f32.gmra.mrb[4].mxu0 %vm240_vm1, %v198_v12  ;;  %835 = vmatmul.mubr.msk.f32.gmra.mrb[4].mxu1 %vm240_vm1, %v215_v13  ;;  %v209_v34 = vld [vmem:[%s1092_s10 + $0x68] sm:$0xff]  ;;  %v210_v36 = vld [vmem:[%s1092_s10 + $0x70] sm:$0xff]  ;;  %v227_v37 = vld [vmem:[%s1092_s10 + $0xf8] sm:$0xff] }
  0x23   : > { %786 = vmatprep.mubr.msk.f32.mxu0 %vm995_vm0, %v996_v6  ;;  %837 = vmatprep.mubr.msk.f32.mxu1 %vm995_vm0, %v996_v6  ;;  %v211_v38 = vld [vmem:[%s1092_s10 + $0x78] sm:$0xff]  ;;  %v228_v39 = vld [vmem:[%s1092_s10 + $0x100] sm:$0xff] }
  0x24   : > { %v212_v40 = vld [vmem:[%s1092_s10 + $0x80] sm:$0xff] }
  0x26   : > { %787 = vmatmul.mubr.msk.f32.gmra.mrb[6].mxu0 %vm240_vm1, %v199_v14  ;;  %838 = vmatmul.mubr.msk.f32.gmra.mrb[6].mxu1 %vm240_vm1, %v216_v15 }
  0x27   : > { %789 = vmatprep.mubr.msk.f32.mxu0 %vm995_vm0, %v996_v6  ;;  %840 = vmatprep.mubr.msk.f32.mxu1 %vm995_vm0, %v996_v6 }
  0x2a   : > { %790 = vmatmul.mubr.msk.f32.gmra.mrb[8].mxu0 %vm240_vm1, %v200_v16  ;;  %841 = vmatmul.mubr.msk.f32.gmra.mrb[8].mxu1 %vm240_vm1, %v217_v17 }
  0x2b   : > { %792 = vmatprep.mubr.msk.f32.mxu0 %vm995_vm0, %v996_v6  ;;  %843 = vmatprep.mubr.msk.f32.mxu1 %vm995_vm0, %v996_v6 }
  0x2e   : > { %793 = vmatmul.mubr.msk.f32.gmra.mrb[10].mxu0 %vm240_vm1, %v201_v18  ;;  %844 = vmatmul.mubr.msk.f32.gmra.mrb[10].mxu1 %vm240_vm1, %v218_v19 }
  0x2f   : > { %795 = vmatprep.mubr.msk.f32.mxu0 %vm995_vm0, %v996_v6  ;;  %846 = vmatprep.mubr.msk.f32.mxu1 %vm995_vm0, %v996_v6 }
  0x32   : > { %796 = vmatmul.mubr.msk.f32.gmra.mrb[12].mxu0 %vm240_vm1, %v202_v20  ;;  %847 = vmatmul.mubr.msk.f32.gmra.mrb[12].mxu1 %vm240_vm1, %v219_v21 }
  0x33   : > { %798 = vmatprep.mubr.msk.f32.mxu0 %vm995_vm0, %v996_v6  ;;  %849 = vmatprep.mubr.msk.f32.mxu1 %vm995_vm0, %v996_v6 }
  0x36   : > { %799 = vmatmul.mubr.msk.f32.gmra.mrb[14].mxu0 %vm240_vm1, %v203_v22  ;;  %850 = vmatmul.mubr.msk.f32.gmra.mrb[14].mxu1 %vm240_vm1, %v220_v23 }
  0x37   : > { %801 = vmatprep.mubr.msk.f32.mxu0 %vm995_vm0, %v996_v6  ;;  %852 = vmatprep.mubr.msk.f32.mxu1 %vm995_vm0, %v996_v6 }
  0x3a   : > { %802 = vmatmul.mubr.msk.f32.gmra.mrb[16].mxu0 %vm240_vm1, %v204_v24  ;;  %853 = vmatmul.mubr.msk.f32.gmra.mrb[16].mxu1 %vm240_vm1, %v221_v25 }
  0x3b   : > { %804 = vmatprep.mubr.msk.f32.mxu0 %vm995_vm0, %v996_v6  ;;  %855 = vmatprep.mubr.msk.f32.mxu1 %vm995_vm0, %v996_v6 }
  0x3e   : > { %805 = vmatmul.mubr.msk.f32.gmra.mrb[18].mxu0 %vm240_vm1, %v205_v26  ;;  %856 = vmatmul.mubr.msk.f32.gmra.mrb[18].mxu1 %vm240_vm1, %v222_v27 }
  0x3f   : > { %807 = vmatprep.mubr.msk.f32.mxu0 %vm995_vm0, %v996_v6  ;;  %858 = vmatprep.mubr.msk.f32.mxu1 %vm995_vm0, %v996_v6 }
  0x42   : > { %808 = vmatmul.mubr.msk.f32.gmra.mrb[20].mxu0 %vm240_vm1, %v206_v28  ;;  %859 = vmatmul.mubr.msk.f32.gmra.mrb[20].mxu1 %vm240_vm1, %v223_v29 }
  0x43   : > { %810 = vmatprep.mubr.msk.f32.mxu0 %vm995_vm0, %v996_v6  ;;  %861 = vmatprep.mubr.msk.f32.mxu1 %vm995_vm0, %v996_v6 }
  0x46   : > { %811 = vmatmul.mubr.msk.f32.gmra.mrb[22].mxu0 %vm240_vm1, %v207_v30  ;;  %862 = vmatmul.mubr.msk.f32.gmra.mrb[22].mxu1 %vm240_vm1, %v224_v31 }
  0x47   : > { %813 = vmatprep.mubr.msk.f32.mxu0 %vm995_vm0, %v996_v6  ;;  %864 = vmatprep.mubr.msk.f32.mxu1 %vm995_vm0, %v996_v6 }
  0x4a   : > { %814 = vmatmul.mubr.msk.f32.gmra.mrb[24].mxu0 %vm240_vm1, %v208_v32  ;;  %865 = vmatmul.mubr.msk.f32.gmra.mrb[24].mxu1 %vm240_vm1, %v225_v33 }
  0x4b   : > { %816 = vmatprep.mubr.msk.f32.mxu0 %vm995_vm0, %v996_v6  ;;  %867 = vmatprep.mubr.msk.f32.mxu1 %vm995_vm0, %v996_v6 }
  0x4e   : > { %817 = vmatmul.mubr.msk.f32.gmra.mrb[26].mxu0 %vm240_vm1, %v209_v34  ;;  %868 = vmatmul.mubr.msk.f32.gmra.mrb[26].mxu1 %vm240_vm1, %v226_v35 }
  0x4f   : > { %819 = vmatprep.mubr.msk.f32.mxu0 %vm995_vm0, %v996_v6  ;;  %870 = vmatprep.mubr.msk.f32.mxu1 %vm995_vm0, %v996_v6 }
  0x52   : > { %820 = vmatmul.mubr.msk.f32.gmra.mrb[28].mxu0 %vm240_vm1, %v210_v36  ;;  %871 = vmatmul.mubr.msk.f32.gmra.mrb[28].mxu1 %vm240_vm1, %v227_v37 }
  0x53   : > { %822 = vmatprep.mubr.msk.f32.mxu0 %vm995_vm0, %v996_v6  ;;  %873 = vmatprep.mubr.msk.f32.mxu1 %vm995_vm0, %v996_v6 }
  0x56   : > { %823 = vmatmul.mubr.msk.f32.gmra.mrb[30].mxu0 %vm240_vm1, %v211_v38  ;;  %874 = vmatmul.mubr.msk.f32.gmra.mrb[30].mxu1 %vm240_vm1, %v228_v39 }
  0x57   : > { %825 = vmatprep.mubr.msk.f32.mxu0 %vm995_vm0, %v996_v6 }
  0x5a   : > { %826 = vmatmul.mubr.msk.f32.gmra.mrb[32].mxu0 %vm240_vm1, %v212_v40 }
  0xed   : > { %v406_v42 = vpop.f32.mrb[0].mxu0  ;;  %v491_v43 = vpop.f32.mrb[0].mxu1 }
  0xee   : > { %v407_v44 = vadd.f32 %v1228_v41, %v406_v42  ;;  %v779_v45 = vpop.f32.mrb[1].mxu0  ;;  %v492_v46 = vadd.f32 %v1228_v41, %v491_v43  ;;  %v830_v47 = vpop.f32.mrb[1].mxu1 }
  0xf0   : > { %570 = vst [vmem:[%s1232_s24] sm:$0xff] %v407_v44  ;;  %587 = vst [vmem:[%s1232_s24 + $0x88] sm:$0xff] %v492_v46 }
  0xf1   : > { %v411_v48 = vpop.f32.mrb[2].mxu0  ;;  %v496_v49 = vpop.f32.mrb[2].mxu1 }
  0xf2   : > { %v412_v50 = vadd.f32 %v1228_v41, %v411_v48  ;;  %v782_v51 = vpop.f32.mrb[3].mxu0  ;;  %v497_v52 = vadd.f32 %v1228_v41, %v496_v49  ;;  %v833_v53 = vpop.f32.mrb[3].mxu1 }
  0xf4   : > { %571 = vst [vmem:[%s1232_s24 + $0x8] sm:$0xff] %v412_v50  ;;  %588 = vst [vmem:[%s1232_s24 + $0x90] sm:$0xff] %v497_v52 }
  0xf5   : > { %v416_v54 = vpop.f32.mrb[4].mxu0  ;;  %v501_v55 = vpop.f32.mrb[4].mxu1 }
  0xf6   : > { %v417_v56 = vadd.f32 %v1228_v41, %v416_v54  ;;  %v785_v57 = vpop.f32.mrb[5].mxu0  ;;  %v502_v58 = vadd.f32 %v1228_v41, %v501_v55  ;;  %v836_v59 = vpop.f32.mrb[5].mxu1 }
  0xf8   : > { %572 = vst [vmem:[%s1232_s24 + $0x10] sm:$0xff] %v417_v56  ;;  %589 = vst [vmem:[%s1232_s24 + $0x98] sm:$0xff] %v502_v58 }
  0xf9   : > { %v421_v60 = vpop.f32.mrb[6].mxu0  ;;  %v506_v61 = vpop.f32.mrb[6].mxu1 }
  0xfa   : > { %v422_v62 = vadd.f32 %v1228_v41, %v421_v60  ;;  %v788_v63 = vpop.f32.mrb[7].mxu0  ;;  %v507_v0 = vadd.f32 %v1228_v41, %v506_v61  ;;  %v839_v1 = vpop.f32.mrb[7].mxu1 }
  0xfc   : > { %573 = vst [vmem:[%s1232_s24 + $0x18] sm:$0xff] %v422_v62  ;;  %590 = vst [vmem:[%s1232_s24 + $0xa0] sm:$0xff] %v507_v0 }
  0xfd   : > { %v426_v2 = vpop.f32.mrb[8].mxu0  ;;  %v511_v3 = vpop.f32.mrb[8].mxu1 }
  0xfe   : > { %v427_v4 = vadd.f32 %v1228_v41, %v426_v2  ;;  %v791_v5 = vpop.f32.mrb[9].mxu0  ;;  %v512_v6 = vadd.f32 %v1228_v41, %v511_v3  ;;  %v842_v7 = vpop.f32.mrb[9].mxu1 }
 0x100   : > { %574 = vst [vmem:[%s1232_s24 + $0x20] sm:$0xff] %v427_v4  ;;  %591 = vst [vmem:[%s1232_s24 + $0xa8] sm:$0xff] %v512_v6 }
 0x101   : > { %v431_v8 = vpop.f32.mrb[10].mxu0  ;;  %v516_v9 = vpop.f32.mrb[10].mxu1 }
 0x102   : > { %v432_v10 = vadd.f32 %v1228_v41, %v431_v8  ;;  %v794_v11 = vpop.f32.mrb[11].mxu0  ;;  %v517_v12 = vadd.f32 %v1228_v41, %v516_v9  ;;  %v845_v13 = vpop.f32.mrb[11].mxu1 }
 0x104   : > { %575 = vst [vmem:[%s1232_s24 + $0x28] sm:$0xff] %v432_v10  ;;  %592 = vst [vmem:[%s1232_s24 + $0xb0] sm:$0xff] %v517_v12 }
 0x105   : > { %v436_v14 = vpop.f32.mrb[12].mxu0  ;;  %v521_v15 = vpop.f32.mrb[12].mxu1 }
 0x106   : > { %v437_v16 = vadd.f32 %v1228_v41, %v436_v14  ;;  %v797_v17 = vpop.f32.mrb[13].mxu0  ;;  %v522_v18 = vadd.f32 %v1228_v41, %v521_v15  ;;  %v848_v19 = vpop.f32.mrb[13].mxu1 }
 0x108   : > { %576 = vst [vmem:[%s1232_s24 + $0x30] sm:$0xff] %v437_v16  ;;  %593 = vst [vmem:[%s1232_s24 + $0xb8] sm:$0xff] %v522_v18 }
 0x109   : > { %v441_v20 = vpop.f32.mrb[14].mxu0  ;;  %v526_v21 = vpop.f32.mrb[14].mxu1 }
 0x10a   : > { %v442_v22 = vadd.f32 %v1228_v41, %v441_v20  ;;  %v800_v23 = vpop.f32.mrb[15].mxu0  ;;  %v527_v24 = vadd.f32 %v1228_v41, %v526_v21  ;;  %v851_v25 = vpop.f32.mrb[15].mxu1 }
 0x10c   : > { %577 = vst [vmem:[%s1232_s24 + $0x38] sm:$0xff] %v442_v22  ;;  %594 = vst [vmem:[%s1232_s24 + $0xc0] sm:$0xff] %v527_v24 }
 0x10d   : > { %v446_v26 = vpop.f32.mrb[16].mxu0  ;;  %v531_v27 = vpop.f32.mrb[16].mxu1 }
 0x10e   : > { %v447_v28 = vadd.f32 %v1228_v41, %v446_v26  ;;  %v803_v29 = vpop.f32.mrb[17].mxu0  ;;  %v532_v30 = vadd.f32 %v1228_v41, %v531_v27  ;;  %v854_v31 = vpop.f32.mrb[17].mxu1 }
 0x110   : > { %578 = vst [vmem:[%s1232_s24 + $0x40] sm:$0xff] %v447_v28  ;;  %595 = vst [vmem:[%s1232_s24 + $0xc8] sm:$0xff] %v532_v30 }
 0x111   : > { %v451_v32 = vpop.f32.mrb[18].mxu0  ;;  %v536_v33 = vpop.f32.mrb[18].mxu1 }
 0x112   : > { %v452_v34 = vadd.f32 %v1228_v41, %v451_v32  ;;  %v806_v35 = vpop.f32.mrb[19].mxu0  ;;  %v537_v36 = vadd.f32 %v1228_v41, %v536_v33  ;;  %v857_v37 = vpop.f32.mrb[19].mxu1 }
 0x114   : > { %579 = vst [vmem:[%s1232_s24 + $0x48] sm:$0xff] %v452_v34  ;;  %596 = vst [vmem:[%s1232_s24 + $0xd0] sm:$0xff] %v537_v36 }
 0x115   : > { %v456_v38 = vpop.f32.mrb[20].mxu0  ;;  %v541_v39 = vpop.f32.mrb[20].mxu1 }
 0x116   : > { %v457_v40 = vadd.f32 %v1228_v41, %v456_v38  ;;  %v809_v42 = vpop.f32.mrb[21].mxu0  ;;  %v542_v43 = vadd.f32 %v1228_v41, %v541_v39  ;;  %v860_v44 = vpop.f32.mrb[21].mxu1 }
 0x118   : > { %580 = vst [vmem:[%s1232_s24 + $0x50] sm:$0xff] %v457_v40  ;;  %597 = vst [vmem:[%s1232_s24 + $0xd8] sm:$0xff] %v542_v43 }
 0x119   : > { %v461_v45 = vpop.f32.mrb[22].mxu0  ;;  %v546_v46 = vpop.f32.mrb[22].mxu1 }
 0x11a   : > { %v462_v47 = vadd.f32 %v1228_v41, %v461_v45  ;;  %v812_v48 = vpop.f32.mrb[23].mxu0  ;;  %v547_v49 = vadd.f32 %v1228_v41, %v546_v46  ;;  %v863_v50 = vpop.f32.mrb[23].mxu1 }
 0x11c   : > { %581 = vst [vmem:[%s1232_s24 + $0x58] sm:$0xff] %v462_v47  ;;  %598 = vst [vmem:[%s1232_s24 + $0xe0] sm:$0xff] %v547_v49 }
 0x11d   : > { %v466_v51 = vpop.f32.mrb[24].mxu0  ;;  %v551_v52 = vpop.f32.mrb[24].mxu1 }
 0x11e   : > { %v467_v53 = vadd.f32 %v1228_v41, %v466_v51  ;;  %v815_v54 = vpop.f32.mrb[25].mxu0  ;;  %v552_v55 = vadd.f32 %v1228_v41, %v551_v52  ;;  %v866_v56 = vpop.f32.mrb[25].mxu1 }
 0x120   : > { %582 = vst [vmem:[%s1232_s24 + $0x60] sm:$0xff] %v467_v53  ;;  %599 = vst [vmem:[%s1232_s24 + $0xe8] sm:$0xff] %v552_v55 }
 0x121   : > { %v471_v57 = vpop.f32.mrb[26].mxu0  ;;  %v556_v58 = vpop.f32.mrb[26].mxu1 }
 0x122   : > { %v472_v59 = vadd.f32 %v1228_v41, %v471_v57  ;;  %v818_v60 = vpop.f32.mrb[27].mxu0  ;;  %v557_v61 = vadd.f32 %v1228_v41, %v556_v58  ;;  %v869_v62 = vpop.f32.mrb[27].mxu1 }
 0x124   : > { %583 = vst [vmem:[%s1232_s24 + $0x68] sm:$0xff] %v472_v59  ;;  %600 = vst [vmem:[%s1232_s24 + $0xf0] sm:$0xff] %v557_v61 }
 0x125   : > { %v476_v63 = vpop.f32.mrb[28].mxu0  ;;  %v561_v0 = vpop.f32.mrb[28].mxu1 }
 0x126   : > { %v477_v1 = vadd.f32 %v1228_v41, %v476_v63  ;;  %v821_v2 = vpop.f32.mrb[29].mxu0  ;;  %v562_v3 = vadd.f32 %v1228_v41, %v561_v0  ;;  %v872_v4 = vpop.f32.mrb[29].mxu1 }
 0x128   : > { %584 = vst [vmem:[%s1232_s24 + $0x70] sm:$0xff] %v477_v1  ;;  %601 = vst [vmem:[%s1232_s24 + $0xf8] sm:$0xff] %v562_v3 }
 0x129   : > { %v481_v5 = vpop.f32.mrb[30].mxu0  ;;  %v566_v6 = vpop.f32.mrb[30].mxu1 }
 0x12a   : > { %v482_v7 = vadd.f32 %v1228_v41, %v481_v5  ;;  %v824_v8 = vpop.f32.mrb[31].mxu0  ;;  %v567_v9 = vadd.f32 %v1228_v41, %v566_v6  ;;  %v875_v10 = vpop.f32.mrb[31].mxu1  ;;  %610 = sbr.rel (!%p1058_p5) target bundleno = 333 (0x14d), region = 36 }
 0x12c   : > { %585 = vst [vmem:[%s1232_s24 + $0x78] sm:$0xff] %v482_v7  ;;  %602 = vst [vmem:[%s1232_s24 + $0x100] sm:$0xff] %v567_v9 }
 0x12d   : > { %v486_v11 = vpop.f32.mrb[32].mxu0 }
 0x12e   : > { %v487_v12 = vadd.f32 %v1228_v41, %v486_v11  ;;  %v827_v13 = vpop.f32.mrb[33].mxu0 }
 0x130   : > { %586 = vst [vmem:[%s1232_s24 + $0x80] sm:$0xff] %v487_v12 }
 0x131   : > { %s1372_s26 = smov (!%p613_p11, %s612_s26), 33 }
 0x132   : > { %s1305_s27 = sshll.u32 %s1372_s26, 7 }
 0x133   : > { %s617_s28 = ssub.s32 4224, %s1305_s27 }
 0x134   : > { %618 = vsyncadd %s1300_s25, %s617_s28  ;;  %p725_p12 = scmp.ne.s32.totalorder %s1305_s27, 0  ;;  %s731_s29 = smul.u32 4224, %s1041_s16 }
 0x135   : > { %s623_s30 = sshll.u32 %s1232_s24, 4  ;;  %s997_s7 = smov [#allocation2]   ;;  %s1317_s30 = int_to_ptr.vmem [resolvable:$true] %s623_s30 }
 0x136   : > { %s1315_s6 = scalar_lea.hbm %s1364_s3, %s731_s29  ;;  %s930_s5 = scalar_lea.vmem %s1317_s30, %s1305_s27 }
 0x137   : > { %p931_p13 = scmp.ne.s32.totalorder %s1317_s30, %s930_s5  ;;  %s934_s8 = sshll.u32 %s997_s7, 4  ;;  %s935_s8 = int_to_ptr.vmem [resolvable:$false] %s934_s8 }
 0x138   : > { %s936_s16 = scalar_lea.vmem %s935_s8, 8448  ;;  %p937_p2 = scmp.lt.s32.totalorder %s1317_s30, %s935_s8 }
 0x139   : > { %p932_p0 = pnand %p931_p13, %p725_p12  ;;  %p938_p3 = scmp.lt.s32.totalorder %s936_s16, %s930_s5 }
 0x13b   : > { %p933_p1 = pneg %p932_p0  ;;  %p939_p4 = por %p938_p3, %p937_p2 }
 0x13d   : > { %p940_p5 = pnand %p939_p4, %p933_p1 }
 0x13f   : > { %943 = shalt.err (!%p940_p5)
}
 0x140   : > { %s944_s9 = scalar_lea.hbm %s1315_s6, %s1305_s27  ;;  %s948_s17 = scalar_lea.hbm %s1364_s3, 8320 }
 0x141   : > { %p945_p7 = scmp.ne.s32.totalorder %s1315_s6, %s944_s9  ;;  %p949_p10 = scmp.lt.u32.totalorder %s1315_s6, %s1364_s3 }
 0x142   : > { %p950_p11 = scmp.lt.u32.totalorder %s948_s17, %s944_s9  ;;  %p952_p0 = scmp.lt.u32.totalorder %s944_s9, %s1315_s6 }
 0x143   : > { %p946_p8 = pnand %p945_p7, %p725_p12 }
 0x144   : > { %p951_p13 = por %p950_p11, %p949_p10 }
 0x145   : > { %p947_p9 = pneg %p946_p8 }
 0x146   : > { %p953_p1 = por %p952_p0, %p951_p13 }
 0x148   : > { %p954_p2 = pnand %p953_p1, %p947_p9 }
 0x14a   : > { %957 = shalt.err (!%p954_p2)
}
 0x14b   : > { %s998_s24 = smov 128   ;;  %s999_s26 = smov 8  }
 0x14c   : > { %629 = dma.vmem_to_hbm [thread:$0]  (%p725_p12), %s1317_s30, %s1305_s27, %s1315_s6, %s1300_s25, %s998_s24, %s998_s24, %s999_s26  }
 0x14d PF: > { %p892_p3 = scmp.ge.s32.totalorder %s992_s15, 2  ;;  %s638_s28 = sand.u32 1, %s980_s12  }
 0x14e   : > { %s639_s29 = scalar_lea.sflag [#allocation3], %s638_s28 }
 0x14f   : > { %p889_p4 = pnand %p892_p3, %p1062_p6 }
 0x151   : > { %975 = dma.done.wait (!%p889_p4), %s639_s29, 4224  }
 0x152   : > { %977 = vsyncadd (!%p889_p4), %s639_s29, 4294963072  ;;  %p13_p5 = scmp.ge.s32.totalorder %s1045_s18, 4   ;;  %s1367_s12 = smov %s984_s13 }
 0x153   : > { %s1368_s13 = smov %s988_s14  ;;  %s1369_s14 = smov %s1056_s21 }
 0x154   : > { %s1370_s15 = smov %s1045_s18  ;;  %15 = sbr.rel (!%p13_p5) target bundleno = 3 (0x3), region = 67 }
 0x15b   :  { %644 = vsyncpa [#allocation3], 1 }
 0x15c   :  { %646 = vsyncpa [#allocation3 + $0x1], 1 }

</bundles_post_ra>
